<compile_context>
chip_gen: v5e
topology: v5e:2x2
jax: 0.10.0
libtpu: 0.0.40
codegen_flags: <defaults>
</compile_context>

<pallas_src>
import jax
import jax.numpy as jnp
from jax.experimental import pallas as pl
from jax.experimental.pallas import tpu as pltpu


def _round_up(n: int, m: int) -> int:
    return ((n + m - 1) // m) * m


def _make_encoder_kernel(num_hidden: int, matmul_dtype):
    """Kernel for: x -> [Linear+ReLU]*num_hidden -> (Linear_mu, Linear_sp).

    Ref order:
      x, (w0, b0), ..., (w_{H-1}, b_{H-1}), w_mu, b_mu, w_sp, b_sp, mu_out, sp_out
    Weights arrive already cast to `matmul_dtype`; biases are f32 [1, out].
    Accumulation and all elementwise math (ReLU, softplus) are f32.
    """

    def kernel(*refs):
        x_ref = refs[0]
        p = refs[1:1 + 2 * num_hidden + 4]
        mu_ref = refs[-2]
        sp_ref = refs[-1]

        h = x_ref[...].astype(jnp.float32)

        # Hidden layers: Linear + ReLU (MLP with output_non_linearity=False).
        for layer in range(num_hidden):
            w = p[2 * layer][...]            # [in, out], matmul_dtype
            b = p[2 * layer + 1][...]        # [1, out], f32 (broadcasts over batch)
            h = jnp.dot(h.astype(matmul_dtype), w,
                        preferred_element_type=jnp.float32) + b
            h = jnp.maximum(h, 0.0)          # ReLU in f32 on the VPU

        # Final layer, split into two lane-aligned matmuls (mu / sigma halves).
        w_mu = p[2 * num_hidden][...]
        b_mu = p[2 * num_hidden + 1][...]
        w_sp = p[2 * num_hidden + 2][...]
        b_sp = p[2 * num_hidden + 3][...]

        hm = h.astype(matmul_dtype)
        mu = jnp.dot(hm, w_mu, preferred_element_type=jnp.float32) + b_mu
        raw = jnp.dot(hm, w_sp, preferred_element_type=jnp.float32) + b_sp

        mu_ref[...] = mu
        # numerically stable softplus: max(x, 0) + log1p(exp(-|x|))
        sp_ref[...] = jnp.maximum(raw, 0.0) + jnp.log1p(jnp.exp(-jnp.abs(raw)))

    return kernel


def encoder_forward(x, weights, biases, z_size, *,
                    matmul_dtype=jnp.bfloat16, batch_tile=256):
    """x: [B, x_size]; weights[i]: [in_i, out_i]; biases[i]: [1, out_i].

    Returns (mu, sigma) with sigma = softplus(second half of last layer).
    """
    num_layers = len(weights)
    assert len(biases) == num_layers
    num_hidden = num_layers - 1
    B, x_size = x.shape
    out_dim = weights[-1].shape[1]
    assert out_dim == 2 * z_size

    # Split the final layer in the wrapper so the kernel never slices at a
    # non-lane-aligned offset.
    w_last, b_last = weights[-1], biases[-1]
    w_mu, w_sp = w_last[:, :z_size], w_last[:, z_size:]
    b_mu, b_sp = b_last[:, :z_size], b_last[:, z_size:]

    def wcast(w):  # matmul operands to MXU dtype (halves weight DMA/VMEM)
        return w.astype(matmul_dtype)

    param_inputs = []
    for w, b in zip(weights[:-1], biases[:-1]):
        param_inputs += [wcast(w), b.astype(jnp.float32)]
    param_inputs += [wcast(w_mu), b_mu.astype(jnp.float32),
                     wcast(w_sp), b_sp.astype(jnp.float32)]

    # Batch tiling: TB rows per grid step (multiple of 8 sublanes), pad B up.
    TB = max(8, min(int(batch_tile), _round_up(B, 8)))
    B_pad = _round_up(B, TB)
    if B_pad != B:
        x = jnp.pad(x, ((0, B_pad - B), (0, 0)))
    grid = (B_pad // TB,)

    def const_spec(arr):
        nd = arr.ndim
        return pl.BlockSpec(arr.shape, lambda i, _nd=nd: (0,) * _nd)

    in_specs = [pl.BlockSpec((TB, x_size), lambda i: (i, 0))]
    in_specs += [const_spec(a) for a in param_inputs]

    out_specs = (
        pl.BlockSpec((TB, z_size), lambda i: (i, 0)),
        pl.BlockSpec((TB, z_size), lambda i: (i, 0)),
    )
    out_shape = (
        jax.ShapeDtypeStruct((B_pad, z_size), jnp.float32),
        jax.ShapeDtypeStruct((B_pad, z_size), jnp.float32),
    )

    kernel = _make_encoder_kernel(num_hidden, matmul_dtype)

    mu, sp = pl.pallas_call(
        kernel,
        grid=grid,
        in_specs=in_specs,
        out_specs=out_specs,
        out_shape=out_shape,
        compiler_params=pltpu.CompilerParams(
            dimension_semantics=("parallel",)),
    )(x, *param_inputs)

    if B_pad != B:
        mu, sp = mu[:B], sp[:B]
    return mu, sp


def init_encoder_params(key, x_size, h_sizes, z_size):
    """Deterministic init mimicking PyTorch nn.Linear default (uniform ±1/sqrt(fan_in))."""
    out_sizes = list(h_sizes) + [2 * z_size]
    in_sizes = [x_size] + out_sizes[:-1]
    weights, biases = [], []
    for fan_in, fan_out in zip(in_sizes, out_sizes):
        key, kw, kb = jax.random.split(key, 3)
        bound = 1.0 / (fan_in ** 0.5)
        w = jax.random.uniform(kw, (fan_in, fan_out), jnp.float32, -bound, bound)
        b = jax.random.uniform(kb, (1, fan_out), jnp.float32, -bound, bound)
        weights.append(w)
        biases.append(b)
    return weights, biases


def encoder_reference(x, weights, biases, z_size):
    """Pure-JAX (f32) reference of the PyTorch Encoder forward."""
    h = x
    n = len(weights)
    for i, (w, b) in enumerate(zip(weights, biases)):
        h = h @ w + b
        if i < n - 1:
            h = jnp.maximum(h, 0.0)
    return h[:, :z_size], jax.nn.softplus(h[:, z_size:])


if __name__ == "__main__":
    # Small shapes consistent with the module:
    #   x_size=16, h_sizes=[32, 32], z_size=8, non_linear_layer=ReLU, batch=8
    B, x_size, h_sizes, z_size = 8, 16, [32, 32], 8

    key = jax.random.PRNGKey(0)
    key, kx = jax.random.split(key)
    x = jax.random.normal(kx, (B, x_size), jnp.float32)
    weights, biases = init_encoder_params(key, x_size, h_sizes, z_size)

    mu_ref, sig_ref = encoder_reference(x, weights, biases, z_size)

    # Exact-semantics path: f32 matmuls, tight tolerance.
    mu32, sig32 = encoder_forward(x, weights, biases, z_size,
                                  matmul_dtype=jnp.float32)
    mu32 = jax.block_until_ready(mu32)
    sig32 = jax.block_until_ready(sig32)
    assert mu32.shape == (B, z_size) and sig32.shape == (B, z_size)
    assert jnp.allclose(mu32, mu_ref, atol=1e-5, rtol=1e-5)
    assert jnp.allclose(sig32, sig_ref, atol=1e-5, rtol=1e-5)

    # MXU-optimized path: bf16 matmul operands, f32 accumulation/elementwise.
    mu16, sig16 = encoder_forward(x, weights, biases, z_size,
                                  matmul_dtype=jnp.bfloat16)
    mu16 = jax.block_until_ready(mu16)
    sig16 = jax.block_until_ready(sig16)
    assert jnp.allclose(mu16, mu_ref, atol=5e-2, rtol=5e-2)
    assert jnp.allclose(sig16, sig_ref, atol=5e-2, rtol=5e-2)

    print("KERNEL_OK")
</pallas_src>

<mosaic_0001>
module attributes {stable_mosaic.version = 11 : i64} {
  func.func @kernel(%arg0: i32, %arg1: memref<8x16xf32, #tpu.memory_space<vmem>>, %arg2: memref<16x32xf32, #tpu.memory_space<vmem>>, %arg3: memref<1x32xf32, #tpu.memory_space<vmem>>, %arg4: memref<32x32xf32, #tpu.memory_space<vmem>>, %arg5: memref<1x32xf32, #tpu.memory_space<vmem>>, %arg6: memref<32x8xf32, #tpu.memory_space<vmem>>, %arg7: memref<1x8xf32, #tpu.memory_space<vmem>>, %arg8: memref<32x8xf32, #tpu.memory_space<vmem>>, %arg9: memref<1x8xf32, #tpu.memory_space<vmem>>, %arg10: memref<8x8xf32, #tpu.memory_space<vmem>>, %arg11: memref<8x8xf32, #tpu.memory_space<vmem>>) attributes {dimension_semantics = [#tpu.dimension_semantics<parallel>], iteration_bounds = array<i64: 1>, scalar_prefetch = 0 : i64, scratch_operands = 0 : i64, tpu.core_type = #tpu.core_type<tc>, window_params = [{transform_indices = @transform_0, window_bounds = array<i64: 8, 16>}, {pipeline_mode = #tpu.pipeline_mode<synchronous>, transform_indices = @transform_1, window_bounds = array<i64: 16, 32>}, {pipeline_mode = #tpu.pipeline_mode<synchronous>, transform_indices = @transform_2, window_bounds = array<i64: 1, 32>}, {pipeline_mode = #tpu.pipeline_mode<synchronous>, transform_indices = @transform_3, window_bounds = array<i64: 32, 32>}, {pipeline_mode = #tpu.pipeline_mode<synchronous>, transform_indices = @transform_4, window_bounds = array<i64: 1, 32>}, {pipeline_mode = #tpu.pipeline_mode<synchronous>, transform_indices = @transform_5, window_bounds = array<i64: 32, 8>}, {pipeline_mode = #tpu.pipeline_mode<synchronous>, transform_indices = @transform_6, window_bounds = array<i64: 1, 8>}, {pipeline_mode = #tpu.pipeline_mode<synchronous>, transform_indices = @transform_7, window_bounds = array<i64: 32, 8>}, {pipeline_mode = #tpu.pipeline_mode<synchronous>, transform_indices = @transform_8, window_bounds = array<i64: 1, 8>}, {transform_indices = @transform_9, window_bounds = array<i64: 8, 8>}, {transform_indices = @transform_10, window_bounds = array<i64: 8, 8>}]} {
    %c0 = arith.constant 0 : index
    %c0_0 = arith.constant 0 : index
    %0 = vector.load %arg1[%c0, %c0_0] : memref<8x16xf32, #tpu.memory_space<vmem>>, vector<8x16xf32>
    %c0_1 = arith.constant 0 : index
    %c0_2 = arith.constant 0 : index
    %1 = vector.load %arg2[%c0_1, %c0_2] : memref<16x32xf32, #tpu.memory_space<vmem>>, vector<16x32xf32>
    %c0_3 = arith.constant 0 : index
    %c0_4 = arith.constant 0 : index
    %2 = vector.load %arg3[%c0_3, %c0_4] : memref<1x32xf32, #tpu.memory_space<vmem>>, vector<1x32xf32>
    %cst = arith.constant dense<0.000000e+00> : vector<8x32xf32>
    %3 = tpu.matmul %0, %1, %cst {dimension_numbers = #tpu.dot_dimension_numbers<[1], [0], [0], [1], [0, 0, 1, 1], [], []>} : vector<8x16xf32>, vector<16x32xf32>, vector<8x32xf32> -> vector<8x32xf32>
    %4 = vector.broadcast %2 : vector<1x32xf32> to vector<8x32xf32>
    %5 = arith.addf %3, %4 : vector<8x32xf32>
    %cst_5 = arith.constant 0.000000e+00 : f32
    %6 = vector.broadcast %cst_5 : f32 to vector<8x32xf32>
    %7 = arith.maximumf %5, %6 : vector<8x32xf32>
    %c0_6 = arith.constant 0 : index
    %c0_7 = arith.constant 0 : index
    %8 = vector.load %arg4[%c0_6, %c0_7] : memref<32x32xf32, #tpu.memory_space<vmem>>, vector<32x32xf32>
    %c0_8 = arith.constant 0 : index
    %c0_9 = arith.constant 0 : index
    %9 = vector.load %arg5[%c0_8, %c0_9] : memref<1x32xf32, #tpu.memory_space<vmem>>, vector<1x32xf32>
    %cst_10 = arith.constant dense<0.000000e+00> : vector<8x32xf32>
    %10 = tpu.matmul %7, %8, %cst_10 {dimension_numbers = #tpu.dot_dimension_numbers<[1], [0], [0], [1], [0, 0, 1, 1], [], []>} : vector<8x32xf32>, vector<32x32xf32>, vector<8x32xf32> -> vector<8x32xf32>
    %11 = vector.broadcast %9 : vector<1x32xf32> to vector<8x32xf32>
    %12 = arith.addf %10, %11 : vector<8x32xf32>
    %cst_11 = arith.constant 0.000000e+00 : f32
    %13 = vector.broadcast %cst_11 : f32 to vector<8x32xf32>
    %14 = arith.maximumf %12, %13 : vector<8x32xf32>
    %c0_12 = arith.constant 0 : index
    %c0_13 = arith.constant 0 : index
    %15 = vector.load %arg6[%c0_12, %c0_13] : memref<32x8xf32, #tpu.memory_space<vmem>>, vector<32x8xf32>
    %c0_14 = arith.constant 0 : index
    %c0_15 = arith.constant 0 : index
    %16 = vector.load %arg7[%c0_14, %c0_15] : memref<1x8xf32, #tpu.memory_space<vmem>>, vector<1x8xf32>
    %c0_16 = arith.constant 0 : index
    %c0_17 = arith.constant 0 : index
    %17 = vector.load %arg8[%c0_16, %c0_17] : memref<32x8xf32, #tpu.memory_space<vmem>>, vector<32x8xf32>
    %c0_18 = arith.constant 0 : index
    %c0_19 = arith.constant 0 : index
    %18 = vector.load %arg9[%c0_18, %c0_19] : memref<1x8xf32, #tpu.memory_space<vmem>>, vector<1x8xf32>
    %cst_20 = arith.constant dense<0.000000e+00> : vector<8x8xf32>
    %19 = tpu.matmul %14, %15, %cst_20 {dimension_numbers = #tpu.dot_dimension_numbers<[1], [0], [0], [1], [0, 0, 1, 1], [], []>} : vector<8x32xf32>, vector<32x8xf32>, vector<8x8xf32> -> vector<8x8xf32>
    %20 = vector.broadcast %16 : vector<1x8xf32> to vector<8x8xf32>
    %21 = arith.addf %19, %20 : vector<8x8xf32>
    %cst_21 = arith.constant dense<0.000000e+00> : vector<8x8xf32>
    %22 = tpu.matmul %14, %17, %cst_21 {dimension_numbers = #tpu.dot_dimension_numbers<[1], [0], [0], [1], [0, 0, 1, 1], [], []>} : vector<8x32xf32>, vector<32x8xf32>, vector<8x8xf32> -> vector<8x8xf32>
    %23 = vector.broadcast %18 : vector<1x8xf32> to vector<8x8xf32>
    %24 = arith.addf %22, %23 : vector<8x8xf32>
    %c0_22 = arith.constant 0 : index
    %c0_23 = arith.constant 0 : index
    %25 = vector.load %arg10[%c0_22, %c0_23] : memref<8x8xf32, #tpu.memory_space<vmem>>, vector<8x8xf32>
    tpu.vector_store %arg10[%c0_22, %c0_23], %21 {strides = array<i32>} : memref<8x8xf32, #tpu.memory_space<vmem>>, vector<8x8xf32>,
    %cst_24 = arith.constant 0.000000e+00 : f32
    %26 = vector.broadcast %cst_24 : f32 to vector<8x8xf32>
    %27 = arith.maximumf %24, %26 : vector<8x8xf32>
    %28 = math.absf %24 : vector<8x8xf32>
    %cst_25 = arith.constant 0.000000e+00 : f32
    %29 = vector.broadcast %cst_25 : f32 to vector<8x8xf32>
    %30 = arith.subf %29, %28 : vector<8x8xf32>
    %31 = math.exp %30 : vector<8x8xf32>
    %32 = math.log1p %31 : vector<8x8xf32>
    %33 = arith.addf %27, %32 : vector<8x8xf32>
    %c0_26 = arith.constant 0 : index
    %c0_27 = arith.constant 0 : index
    %34 = vector.load %arg11[%c0_26, %c0_27] : memref<8x8xf32, #tpu.memory_space<vmem>>, vector<8x8xf32>
    tpu.vector_store %arg11[%c0_26, %c0_27], %33 {strides = array<i32>} : memref<8x8xf32, #tpu.memory_space<vmem>>, vector<8x8xf32>,
    return
  }
  func.func @transform_0(%arg0: i32) -> (i32, i32) {
    %c0_i32 = arith.constant 0 : i32
    %c0_i32_0 = arith.constant 0 : i32
    return %arg0, %c0_i32 : i32, i32
  }
  func.func @transform_1(%arg0: i32) -> (i32, i32) {
    %c0_i32 = arith.constant 0 : i32
    %c0_i32_0 = arith.constant 0 : i32
    %c0_i32_1 = arith.constant 0 : i32
    return %c0_i32, %c0_i32_0 : i32, i32
  }
  func.func @transform_2(%arg0: i32) -> (i32, i32) {
    %c0_i32 = arith.constant 0 : i32
    %c0_i32_0 = arith.constant 0 : i32
    %c0_i32_1 = arith.constant 0 : i32
    return %c0_i32, %c0_i32_0 : i32, i32
  }
  func.func @transform_3(%arg0: i32) -> (i32, i32) {
    %c0_i32 = arith.constant 0 : i32
    %c0_i32_0 = arith.constant 0 : i32
    %c0_i32_1 = arith.constant 0 : i32
    return %c0_i32, %c0_i32_0 : i32, i32
  }
  func.func @transform_4(%arg0: i32) -> (i32, i32) {
    %c0_i32 = arith.constant 0 : i32
    %c0_i32_0 = arith.constant 0 : i32
    %c0_i32_1 = arith.constant 0 : i32
    return %c0_i32, %c0_i32_0 : i32, i32
  }
  func.func @transform_5(%arg0: i32) -> (i32, i32) {
    %c0_i32 = arith.constant 0 : i32
    %c0_i32_0 = arith.constant 0 : i32
    %c0_i32_1 = arith.constant 0 : i32
    return %c0_i32, %c0_i32_0 : i32, i32
  }
  func.func @transform_6(%arg0: i32) -> (i32, i32) {
    %c0_i32 = arith.constant 0 : i32
    %c0_i32_0 = arith.constant 0 : i32
    %c0_i32_1 = arith.constant 0 : i32
    return %c0_i32, %c0_i32_0 : i32, i32
  }
  func.func @transform_7(%arg0: i32) -> (i32, i32) {
    %c0_i32 = arith.constant 0 : i32
    %c0_i32_0 = arith.constant 0 : i32
    %c0_i32_1 = arith.constant 0 : i32
    return %c0_i32, %c0_i32_0 : i32, i32
  }
  func.func @transform_8(%arg0: i32) -> (i32, i32) {
    %c0_i32 = arith.constant 0 : i32
    %c0_i32_0 = arith.constant 0 : i32
    %c0_i32_1 = arith.constant 0 : i32
    return %c0_i32, %c0_i32_0 : i32, i32
  }
  func.func @transform_9(%arg0: i32) -> (i32, i32) {
    %c0_i32 = arith.constant 0 : i32
    %c0_i32_0 = arith.constant 0 : i32
    return %arg0, %c0_i32 : i32, i32
  }
  func.func @transform_10(%arg0: i32) -> (i32, i32) {
    %c0_i32 = arith.constant 0 : i32
    %c0_i32_0 = arith.constant 0 : i32
    return %arg0, %c0_i32 : i32, i32
  }
}

</mosaic_0001>

<bundles_post_ra>
// kernel: tpu_custom_call.1
= control target key start
LH: loop header
LB: loop body
LE: loop exit
PB: predicated region body
PF: predicated region fallthrough
CT: control target
= control target key end

     0   :  { %16 = vsyncpa [#allocation3], 0  ;;  %vm43_vm0 = vcmask 130048   ;;  %s401_s0 = inlined_call_operand.vmem [shape: f32[8,16], index: 0, kind: input, shape index: {}]   ;;  %s402_s1 = inlined_call_operand.vmem [shape: f32[16,32], index: 1, kind: input, shape index: {}]   ;;  %s403_s2 = inlined_call_operand.vmem [shape: f32[1,32], index: 2, kind: input, shape index: {}]   ;;  %s404_s3 = inlined_call_operand.vmem [shape: f32[32,32], index: 3, kind: input, shape index: {}]   ;;  %s405_s4 = inlined_call_operand.vmem [shape: f32[1,32], index: 4, kind: input, shape index: {}]   ;;  %s406_s5 = inlined_call_operand.vmem [shape: f32[32,8], index: 5, kind: input, shape index: {}]   ;;  %s407_s6 = inlined_call_operand.vmem [shape: f32[1,8], index: 6, kind: input, shape index: {}]   ;;  %s408_s7 = inlined_call_operand.vmem [shape: f32[32,8], index: 7, kind: input, shape index: {}]   ;;  %s409_s8 = inlined_call_operand.vmem [shape: f32[1,8], index: 8, kind: input, shape index: {}]   ;;  %s410_s9 = inlined_call_operand.hbm [shape: f32[8,8], index: 9, kind: output, shape index: {0}]   ;;  %s411_s10 = inlined_call_operand.hbm [shape: f32[8,8], index: 10, kind: output, shape index: {1}]  }
   0x1   :  { %v38_v0 = vld [vmem:[%s402_s1 + $0x8] sm:$0xff]  ;;  %v37_v1 = vld [vmem:[%s402_s1] sm:$0xff]  ;;  %v71_v3 = vld [vmem:[%s404_s3 + $0x18] sm:$0xff] }
   0x2   :  { %61 = vmatpush.msra.mxu0 %v38_v0  ;;  %v36_v2 = vld [vmem:[%s401_s0] sm:$0xff]  ;;  %92 = vmatpush.msra.mxu1 %v71_v3 }
   0x4   :  { %62 = vmatpush.msra.mxu0 %v37_v1 }
   0x5   :  { %17 = vsyncpa [#allocation5], 0  ;;  %210 = vmatmul.msk.f32.vlgmr.msra.gmra.mxu0 %vm43_vm0, %v36_v2  ;;  %v70_v4 = vld [vmem:[%s404_s3 + $0x10] sm:$0xff]  ;;  %v69_v5 = vld [vmem:[%s404_s3 + $0x8] sm:$0xff]  ;;  %vm76_vm1 = vcmask 261120   ;;  %vm160_vm2 = vcmask 64512  }
   0x6   :  { %93 = vmatpush.msra.mxu1 %v70_v4  ;;  %v68_v6 = vld [vmem:[%s404_s3] sm:$0xff]  ;;  %v104_v7 = vld [vmem:[%s406_s5 + $0x18] sm:$0xff]  ;;  %v103_v13 = vld [vmem:[%s406_s5 + $0x10] sm:$0xff]  ;;  %s196_s28 = sshll.u32 %s411_s10, 4  ;;  %s197_s28 = int_to_ptr.hbm [resolvable:$true] %s196_s28 }
   0x7   :  { %v109_v8 = vld [vmem:[%s408_s7 + $0x18] sm:$0xff]  ;;  %129 = vmatpush.msra.mxu2 %v104_v7  ;;  %v216_v9 = vld [vmem:[%s403_s2] ss:$0 sm:$0xff]  ;;  %v108_v14 = vld [vmem:[%s408_s7 + $0x10] sm:$0xff] }
   0x8   :  { %94 = vmatpush.msra.mxu1 %v69_v5  ;;  %152 = vmatpush.msra.mxu3 %v109_v8  ;;  %v102_v15 = vld [vmem:[%s406_s5 + $0x8] sm:$0xff]  ;;  %v101_v17 = vld [vmem:[%s406_s5] sm:$0xff] }
   0x9   :  { %130 = vmatpush.msra.mxu2 %v103_v13  ;;  %v107_v16 = vld [vmem:[%s408_s7 + $0x8] sm:$0xff]  ;;  %v106_v18 = vld [vmem:[%s408_s7] sm:$0xff]  ;;  %s276_s7 = smov [#allocation2]  }
   0xa   :  { %95 = vmatpush.msra.mxu1 %v68_v6  ;;  %153 = vmatpush.msra.mxu3 %v108_v14  ;;  %v217_v19 = vld [vmem:[%s405_s4] ss:$0 sm:$0xff]  ;;  %s183_s24 = sshll.u32 %s276_s7, 4  ;;  %s185_s4 = sshll.u32 %s410_s9, 4  ;;  %s184_s24 = int_to_ptr.vmem [resolvable:$true] %s183_s24  ;;  %s186_s4 = int_to_ptr.hbm [resolvable:$true] %s185_s4 }
   0xb   :  { %131 = vmatpush.msra.mxu2 %v102_v15  ;;  %v218_v23 = vld [vmem:[%s407_s6] ss:$0 sm:$0xff]  ;;  %s277_s6 = smov [#allocation4]  }
   0xc   :  { %154 = vmatpush.msra.mxu3 %v107_v16  ;;  %v219_v24 = vld [vmem:[%s409_s8] ss:$0 sm:$0xff]  ;;  %s194_s8 = sshll.u32 %s277_s6, 4  ;;  %s195_s8 = int_to_ptr.vmem [resolvable:$true] %s194_s8 }
   0xd   :  { %132 = vmatpush.msra.mxu2 %v101_v17 }
   0xe   :  { %155 = vmatpush.msra.mxu3 %v106_v18 }
  0x82   :  { %v64_v10 = vpop.f32.mrf.mxu0 }
  0x83   :  { %v65_v11 = vadd.f32 %v216_v9, %v64_v10 }
  0x85   :  { %v67_v12 = vmax.f32 %v65_v11, 0.0 }
  0x87   :  { %211 = vmatmul.msk.f32.vlgmr.msra.gmra.mxu1 %vm76_vm1, %v67_v12 }
 0x104   :  { %v97_v20 = vpop.f32.mrf.mxu1 }
 0x105   :  { %v98_v21 = vadd.f32 %v217_v19, %v97_v20 }
 0x107   :  { %v100_v22 = vmax.f32 %v98_v21, 0.0 }
 0x109   :  { %212 = vmatmul.msk.f32.vlgmr.msra.gmra.mxu2 %vm76_vm1, %v100_v22  ;;  %213 = vmatmul.msk.f32.vlgmr.msra.gmra.mxu3 %vm76_vm1, %v100_v22 }
 0x18c   :  { %v134_v25 = vpop.f32.mrf.mxu2  ;;  %v157_v26 = vpop.f32.mrf.mxu3 }
 0x18d   :  { %v135_v27 = vadd.f32 %v218_v23, %v134_v25  ;;  %v158_v28 = vadd.f32 %v219_v24, %v157_v26 }
 0x18f   :  { %v163_v29 = vand.u32 2147483647, %v158_v28  ;;  %161 = vst.msk [vmem:[#allocation2] sm:$0xff] %vm160_vm2, %v135_v27  ;;  %v162_v40 = vmax.f32 %v158_v28, 0.0 }
 0x190   :  { %188 = dma.vmem_to_hbm [thread:$0]  %s184_s24, 128, %s186_s4, [#allocation3]  }
 0x191   :  { %v164_v30 = vsub.f32 0.0, %v163_v29 }
 0x193   :  { %v165_v31 = vmul.f32 1.442695, %v164_v30 }
 0x195   :  { %220 = vpow2.f32 %v165_v31 }
 0x19b   :  { %v221_v32 = vpop.eup %220 }
 0x19c   :  { %v167_v33 = vadd.f32 1.0, %v221_v32  ;;  %v170_v34 = vmul.f32 -0.5, %v221_v32  ;;  %v173_v36 = vand.u32 2147483647, %v221_v32 }
 0x19e   :  { %222 = vlog2.f32 %v167_v33  ;;  %v171_v35 = vadd.f32 1.0, %v170_v34  ;;  %vm174_vm3 = vcmp.lt.f32.partialorder %v173_v36, 0.0004427343 }
 0x1a0   :  { %v172_v39 = vmul.f32 %v221_v32, %v171_v35 }
 0x1a4   :  { %v223_v37 = vpop.eup %222 }
 0x1a5   :  { %v169_v38 = vmul.f32 0.6931472, %v223_v37 }
 0x1a7   :  { %v175_v41 = vsel %vm174_vm3, %v172_v39, %v169_v38 }
 0x1a8   :  { %v176_v42 = vadd.f32 %v175_v41, %v162_v40 }
 0x1aa   :  { %177 = vst.msk [vmem:[#allocation4] sm:$0xff] %vm160_vm2, %v176_v42 }
 0x1ab   :  { %199 = dma.vmem_to_hbm [thread:$0]  %s195_s8, 128, %s197_s28, [#allocation5]  }
 0x1ac   :  { %272 = dma.done.wait [#allocation3], 128  }
 0x1ad   :  { %273 = vsyncadd [#allocation3], 4294967168 }
 0x1ae   :  { %274 = dma.done.wait [#allocation5], 128  }
 0x1af   :  { %275 = vsyncadd [#allocation5], 4294967168 }
 0x1b0   :  { %208 = vsyncpa [#allocation3], 1 }
 0x1b1   :  { %209 = vsyncpa [#allocation5], 1 }

</bundles_post_ra>
